<compile_context>
chip_gen: v5e
topology: v5e:2x2
jax: 0.10.0
libtpu: 0.0.40
codegen_flags: <defaults>
</compile_context>

<pallas_src>
import functools

import jax
import jax.numpy as jnp
from jax.experimental import pallas as pl
from jax.experimental.pallas import tpu as pltpu

HIDDEN = 32
EPS = 1e-5  # torch.nn.LayerNorm default eps


def _round_up(x, m):
    return (x + m - 1) // m * m


# ---------------------------------------------------------------------------
# Kernel A: fused val_enc + val_send, row-tiled.
# ---------------------------------------------------------------------------
def mlp_kernel(x_ref, a_ref, w1_ref, w1a_ref, b1_ref, w2_ref, g1_ref, be1_ref,
               w3_ref, g2_ref, be2_ref, xval_ref, msg_ref):
    x = x_ref[...]                                           # (TM, H) f32

    # val_enc Linear(H+1 -> H, bias): MXU bf16 matmul on the H columns plus a
    # rank-1 VPU update for the assignment column (keeps K at a clean 32).
    h = jnp.dot(x.astype(jnp.bfloat16), w1_ref[...],
                preferred_element_type=jnp.float32)
    h = h + a_ref[...] * w1a_ref[...] + b1_ref[...]
    h = jnp.maximum(h, 0.0)                                  # ReLU

    # val_enc Linear(H -> H, no bias) + LayerNorm(H) (stats in f32).
    h2 = jnp.dot(h.astype(jnp.bfloat16), w2_ref[...],
                 preferred_element_type=jnp.float32)
    mu = jnp.mean(h2, axis=-1, keepdims=True)
    var = jnp.mean((h2 - mu) ** 2, axis=-1, keepdims=True)
    x_val = (h2 - mu) * jax.lax.rsqrt(var + EPS) * g1_ref[...] + be1_ref[...]
    xval_ref[...] = x_val

    # val_send Linear(H -> 4H, no bias) + LayerNorm(4H), computed as 4 H-wide
    # blocks so the message is written directly in block-major (4, TM, H)
    # bf16 layout (avoids a (V,4H)->(4V,H) relayout between kernels).
    hdim = x_val.shape[-1]
    xvb = x_val.astype(jnp.bfloat16)
    m = [jnp.dot(xvb, w3_ref[b], preferred_element_type=jnp.float32)
         for b in range(4)]                                  # 4 x (TM, H) f32

    inv_n = 1.0 / (4 * hdim)
    mu2 = sum(jnp.sum(mb, axis=-1, keepdims=True) for mb in m) * inv_n
    var2 = sum(jnp.sum((mb - mu2) ** 2, axis=-1, keepdims=True)
               for mb in m) * inv_n
    inv2 = jax.lax.rsqrt(var2 + EPS)
    for b in range(4):
        msg_ref[b] = (((m[b] - mu2) * inv2) * g2_ref[b]
                      + be2_ref[b]).astype(msg_ref.dtype)


# ---------------------------------------------------------------------------
# Kernel B: scatter-reduce of gathered messages into num_cst rows.
# ---------------------------------------------------------------------------
def make_agg_kernel(aggr, tc, te):
    # TODO(synk): aggr='max' is not implemented (no matmul formulation).
    assert aggr in ('sum', 'mean')

    def agg_kernel(g_ref, idx_ref, r_ref, cnt_ref):
        j = pl.program_id(1)

        @pl.when(j == 0)
        def _init():
            r_ref[...] = jnp.zeros_like(r_ref)
            cnt_ref[...] = jnp.zeros_like(cnt_ref)

        c0 = pl.program_id(0) * tc
        cid = jax.lax.broadcasted_iota(jnp.int32, (tc, te), 0) + c0
        hit = cid == idx_ref[...]                            # (tc, te) bool
        # bf16 one-hot (exact 0/1) on the MXU, f32 accumulation in the output.
        r_ref[...] += jnp.dot(hit.astype(jnp.bfloat16), g_ref[...],
                              preferred_element_type=jnp.float32)

        if aggr == 'mean':
            cnt_ref[...] += jnp.sum(hit.astype(jnp.float32), axis=1,
                                    keepdims=True)

            @pl.when(j == pl.num_programs(1) - 1)
            def _finalize():
                r_ref[...] *= pl.reciprocal(
                    jnp.maximum(cnt_ref[...], 1.0), approx=True)

    return agg_kernel


# ---------------------------------------------------------------------------
# Parameters ("x @ W" column-major application convention).
# ---------------------------------------------------------------------------
def init_params(key, hidden):
    ks = jax.random.split(key, 4)
    s = 0.05
    return dict(
        w1=jax.random.normal(ks[0], (hidden + 1, hidden), jnp.float32) * s,
        b1=jax.random.normal(ks[1], (1, hidden), jnp.float32) * s,
        w2=jax.random.normal(ks[2], (hidden, hidden), jnp.float32) * s,
        g1=jnp.ones((1, hidden), jnp.float32),
        be1=jnp.zeros((1, hidden), jnp.float32),
        w3=jax.random.normal(ks[3], (hidden, 4 * hidden), jnp.float32) * s,
        g2=jnp.ones((1, 4 * hidden), jnp.float32),
        be2=jnp.zeros((1, 4 * hidden), jnp.float32),
    )


# ---------------------------------------------------------------------------
# Forward wrapper.
# ---------------------------------------------------------------------------
@functools.partial(jax.jit, static_argnames=('num_cst', 'aggr', 'use_PE'))
def val2cst_forward(params, h_val, assign, cst_edges, LE, PE, *, num_cst,
                    aggr='mean', use_PE=True):
    f32 = jnp.float32
    num_val, hidden = h_val.shape

    # ---- row tiling for the MLP kernel -------------------------------------
    TM = min(512, _round_up(num_val, 8))
    V_pad = _round_up(num_val, TM)

    # torch: cat([h_val, assign.view(-1,1).half()], 1). The .half() is mimicked
    # by an f16 round-trip (exact for binary assignments).
    assign_col = assign.astype(jnp.float16).astype(f32).reshape(-1, 1)
    hv = jnp.pad(h_val.astype(f32), ((0, V_pad - num_val), (0, 0)))
    ac = jnp.pad(assign_col, ((0, V_pad - num_val), (0, 0)))

    # weight prep: bf16 operands for the MXU, f32 bias / LN params.
    w1 = params['w1']
    w1_main = w1[:hidden].astype(jnp.bfloat16)                       # (H, H)
    w1_asg = w1[hidden:hidden + 1].astype(f32)                       # (1, H)
    b1 = params['b1'].astype(f32)
    w2b = params['w2'].astype(jnp.bfloat16)
    g1 = params['g1'].astype(f32)
    be1 = params['be1'].astype(f32)
    w3s = params['w3'].reshape(hidden, 4, hidden).transpose(1, 0, 2) \
        .astype(jnp.bfloat16)                                        # (4, H, H)
    g2s = params['g2'].reshape(1, 4, hidden).transpose(1, 0, 2).astype(f32)
    be2s = params['be2'].reshape(1, 4, hidden).transpose(1, 0, 2).astype(f32)

    row = lambda i: (i, 0)
    rep2 = lambda i: (0, 0)
    rep3 = lambda i: (0, 0, 0)

    x_val_p, msg3 = pl.pallas_call(
        mlp_kernel,
        out_shape=(jax.ShapeDtypeStruct((V_pad, hidden), f32),
                   jax.ShapeDtypeStruct((4, V_pad, hidden), jnp.bfloat16)),
        grid=(V_pad // TM,),
        in_specs=[
            pl.BlockSpec((TM, hidden), row),          # h_val rows
            pl.BlockSpec((TM, 1), row),               # assign column
            pl.BlockSpec((hidden, hidden), rep2),     # w1 (H x H part)
            pl.BlockSpec((1, hidden), rep2),          # w1 (assign row)
            pl.BlockSpec((1, hidden), rep2),          # b1
            pl.BlockSpec((hidden, hidden), rep2),     # w2
            pl.BlockSpec((1, hidden), rep2),          # g1
            pl.BlockSpec((1, hidden), rep2),          # be1
            pl.BlockSpec((4, hidden, hidden), rep3),  # w3 split per block
            pl.BlockSpec((4, 1, hidden), rep3),       # g2 split per block
            pl.BlockSpec((4, 1, hidden), rep3),       # be2 split per block
        ],
        out_specs=(pl.BlockSpec((TM, hidden), row),
                   pl.BlockSpec((4, TM, hidden), lambda i: (0, i, 0))),
        compiler_params=pltpu.CompilerParams(
            dimension_semantics=("parallel",),
            vmem_limit_bytes=32 * 1024 * 1024),
    )(hv, ac, w1_main, w1_asg, b1, w2b, g1, be1, w3s, g2s, be2s)

    x_val = x_val_p[:num_val]

    # ---- gather (XLA) + tiled scatter-reduce (Pallas) ----------------------
    E = cst_edges.shape[1]
    TE = min(512, _round_up(E, 128))
    E_pad = _round_up(E, TE)
    TC = min(512, _round_up(num_cst, 8))
    C_pad = _round_up(num_cst, TC)

    blk = 2 * LE + (PE if use_PE else jnp.zeros_like(PE))
    # block-major message layout: msg[blk * V_pad + v] == m_val[v, blk*H:(blk+1)*H]
    out_idx = (blk * V_pad + cst_edges[1]).astype(jnp.int32)
    in_idx = cst_edges[0].astype(jnp.int32)

    msg = msg3.reshape(4 * V_pad, hidden)          # leading-dim merge, no relayout
    out_idx_p = jnp.pad(out_idx, (0, E_pad - E))   # pad with a valid (ignored) row
    gathered = jnp.take(msg, out_idx_p, axis=0)    # (E_pad, H) bf16 row gather
    in_idx_p = jnp.pad(in_idx, (0, E_pad - E),
                       constant_values=-1).reshape(1, E_pad)  # -1 => no cst hit

    r_cst_p = pl.pallas_call(
        make_agg_kernel(aggr, TC, TE),
        out_shape=jax.ShapeDtypeStruct((C_pad, hidden), f32),
        grid=(C_pad // TC, E_pad // TE),
        in_specs=[
            pl.BlockSpec((TE, hidden), lambda i, j: (j, 0)),   # gathered msgs
            pl.BlockSpec((1, TE), lambda i, j: (0, j)),        # in_idx (lane-dense)
        ],
        out_specs=pl.BlockSpec((TC, hidden), lambda i, j: (i, 0)),
        scratch_shapes=[pltpu.VMEM((TC, 1), jnp.float32)],     # per-cst counts
        compiler_params=pltpu.CompilerParams(
            dimension_semantics=("parallel", "arbitrary"),
            vmem_limit_bytes=32 * 1024 * 1024),
    )(gathered, in_idx_p)

    return r_cst_p[:num_cst], x_val


# ---------------------------------------------------------------------------
# Pure-JAX reference (mirrors the torch module) for a sanity check.
# ---------------------------------------------------------------------------
def _reference(params, h_val, assign, cst_edges, LE, PE, num_cst, aggr, use_PE):
    def ln(v, g, b):
        mu = v.mean(-1, keepdims=True)
        var = ((v - mu) ** 2).mean(-1, keepdims=True)
        return (v - mu) / jnp.sqrt(var + EPS) * g + b

    acol = assign.astype(jnp.float16).astype(jnp.float32).reshape(-1, 1)
    x = jnp.concatenate([h_val.astype(jnp.float32), acol], axis=1)
    h = jnp.maximum(x @ params['w1'] + params['b1'], 0.0)
    x_val = ln(h @ params['w2'], params['g1'], params['be1'])
    m_val = ln(x_val @ params['w3'], params['g2'], params['be2'])
    msg = m_val.reshape(4 * h_val.shape[0], -1)
    out_idx = 4 * cst_edges[1] + 2 * LE + (PE if use_PE else 0 * PE)
    in_idx = cst_edges[0]
    gathered = msg[out_idx]
    r = jnp.zeros((num_cst, h_val.shape[1]), jnp.float32).at[in_idx].add(gathered)
    if aggr == 'mean':
        cnt = jnp.zeros((num_cst,), jnp.float32).at[in_idx].add(1.0)
        r = r / jnp.maximum(cnt, 1.0)[:, None]
    return r, x_val


if __name__ == "__main__":
    config = {'hidden_dim': HIDDEN, 'aggr_val2cst': 'mean'}

    num_val = 8
    num_cst = 6
    num_edges = 12

    key = jax.random.PRNGKey(0)
    kp, kh, ka, ke0, ke1, kle, kpe = jax.random.split(key, 7)

    params = init_params(kp, config['hidden_dim'])

    h_val = jax.random.normal(kh, (num_val, config['hidden_dim']), jnp.float32)
    assign = jax.random.bernoulli(ka, 0.5, (num_val,)).astype(jnp.float32)
    cst_edges = jnp.stack([
        jax.random.randint(ke0, (num_edges,), 0, num_cst),   # cst index (row 0)
        jax.random.randint(ke1, (num_edges,), 0, num_val),   # val index (row 1)
    ], axis=0)
    LE = jax.random.randint(kle, (num_edges,), 0, 2)
    PE = jax.random.randint(kpe, (num_edges,), 0, 2)

    r_cst, x_val = val2cst_forward(
        params, h_val, assign, cst_edges, LE, PE,
        num_cst=num_cst, aggr=config['aggr_val2cst'], use_PE=True)
    jax.block_until_ready((r_cst, x_val))

    assert r_cst.shape == (num_cst, config['hidden_dim'])
    assert x_val.shape == (num_val, config['hidden_dim'])

    r_ref, x_ref = _reference(params, h_val, assign, cst_edges, LE, PE,
                              num_cst, config['aggr_val2cst'], True)
    assert bool(jnp.allclose(x_val, x_ref, rtol=0.1, atol=0.1))
    assert bool(jnp.allclose(r_cst, r_ref, rtol=0.1, atol=0.1))

    print("KERNEL_OK")
</pallas_src>

<mosaic_0001>
module attributes {stable_mosaic.version = 11 : i64} {
  func.func @mlp_kernel(%arg0: i32, %arg1: memref<8x32xf32, #tpu.memory_space<vmem>>, %arg2: memref<8x1xf32, #tpu.memory_space<vmem>>, %arg3: memref<32x32xbf16, #tpu.memory_space<vmem>>, %arg4: memref<1x32xf32, #tpu.memory_space<vmem>>, %arg5: memref<1x32xf32, #tpu.memory_space<vmem>>, %arg6: memref<32x32xbf16, #tpu.memory_space<vmem>>, %arg7: memref<1x32xf32, #tpu.memory_space<vmem>>, %arg8: memref<1x32xf32, #tpu.memory_space<vmem>>, %arg9: memref<4x32x32xbf16, #tpu.memory_space<vmem>>, %arg10: memref<4x1x32xf32, #tpu.memory_space<vmem>>, %arg11: memref<4x1x32xf32, #tpu.memory_space<vmem>>, %arg12: memref<8x32xf32, #tpu.memory_space<vmem>>, %arg13: memref<4x8x32xbf16, #tpu.memory_space<vmem>>) attributes {dimension_semantics = [#tpu.dimension_semantics<parallel>], iteration_bounds = array<i64: 1>, scalar_prefetch = 0 : i64, scratch_operands = 0 : i64, tpu.core_type = #tpu.core_type<tc>, window_params = [{transform_indices = @transform_0, window_bounds = array<i64: 8, 32>}, {transform_indices = @transform_1, window_bounds = array<i64: 8, 1>}, {pipeline_mode = #tpu.pipeline_mode<synchronous>, transform_indices = @transform_2, window_bounds = array<i64: 32, 32>}, {pipeline_mode = #tpu.pipeline_mode<synchronous>, transform_indices = @transform_3, window_bounds = array<i64: 1, 32>}, {pipeline_mode = #tpu.pipeline_mode<synchronous>, transform_indices = @transform_4, window_bounds = array<i64: 1, 32>}, {pipeline_mode = #tpu.pipeline_mode<synchronous>, transform_indices = @transform_5, window_bounds = array<i64: 32, 32>}, {pipeline_mode = #tpu.pipeline_mode<synchronous>, transform_indices = @transform_6, window_bounds = array<i64: 1, 32>}, {pipeline_mode = #tpu.pipeline_mode<synchronous>, transform_indices = @transform_7, window_bounds = array<i64: 1, 32>}, {pipeline_mode = #tpu.pipeline_mode<synchronous>, transform_indices = @transform_8, window_bounds = array<i64: 4, 32, 32>}, {pipeline_mode = #tpu.pipeline_mode<synchronous>, transform_indices = @transform_9, window_bounds = array<i64: 4, 1, 32>}, {pipeline_mode = #tpu.pipeline_mode<synchronous>, transform_indices = @transform_10, window_bounds = array<i64: 4, 1, 32>}, {transform_indices = @transform_11, window_bounds = array<i64: 8, 32>}, {transform_indices = @transform_12, window_bounds = array<i64: 4, 8, 32>}]} {
    %c0 = arith.constant 0 : index
    %c0_0 = arith.constant 0 : index
    %0 = vector.load %arg1[%c0, %c0_0] : memref<8x32xf32, #tpu.memory_space<vmem>>, vector<8x32xf32>
    %1 = arith.truncf %0 : vector<8x32xf32> to vector<8x32xbf16>
    %c0_1 = arith.constant 0 : index
    %c0_2 = arith.constant 0 : index
    %2 = vector.load %arg3[%c0_1, %c0_2] : memref<32x32xbf16, #tpu.memory_space<vmem>>, vector<32x32xbf16>
    %cst = arith.constant dense<0.000000e+00> : vector<8x32xf32>
    %3 = tpu.matmul %1, %2, %cst {dimension_numbers = #tpu.dot_dimension_numbers<[1], [0], [0], [1], [0, 0, 1, 1], [], []>} : vector<8x32xbf16>, vector<32x32xbf16>, vector<8x32xf32> -> vector<8x32xf32>
    %c0_3 = arith.constant 0 : index
    %c0_4 = arith.constant 0 : index
    %4 = vector.load %arg2[%c0_3, %c0_4] : memref<8x1xf32, #tpu.memory_space<vmem>>, vector<8x1xf32>
    %c0_5 = arith.constant 0 : index
    %c0_6 = arith.constant 0 : index
    %5 = vector.load %arg4[%c0_5, %c0_6] : memref<1x32xf32, #tpu.memory_space<vmem>>, vector<1x32xf32>
    %6 = vector.broadcast %4 : vector<8x1xf32> to vector<8x32xf32>
    %7 = vector.broadcast %5 : vector<1x32xf32> to vector<8x32xf32>
    %8 = arith.mulf %6, %7 : vector<8x32xf32>
    %9 = arith.addf %3, %8 : vector<8x32xf32>
    %c0_7 = arith.constant 0 : index
    %c0_8 = arith.constant 0 : index
    %10 = vector.load %arg5[%c0_7, %c0_8] : memref<1x32xf32, #tpu.memory_space<vmem>>, vector<1x32xf32>
    %11 = vector.broadcast %10 : vector<1x32xf32> to vector<8x32xf32>
    %12 = arith.addf %9, %11 : vector<8x32xf32>
    %cst_9 = arith.constant 0.000000e+00 : f32
    %13 = vector.broadcast %cst_9 : f32 to vector<8x32xf32>
    %14 = arith.maximumf %12, %13 : vector<8x32xf32>
    %15 = arith.truncf %14 : vector<8x32xf32> to vector<8x32xbf16>
    %c0_10 = arith.constant 0 : index
    %c0_11 = arith.constant 0 : index
    %16 = vector.load %arg6[%c0_10, %c0_11] : memref<32x32xbf16, #tpu.memory_space<vmem>>, vector<32x32xbf16>
    %cst_12 = arith.constant dense<0.000000e+00> : vector<8x32xf32>
    %17 = tpu.matmul %15, %16, %cst_12 {dimension_numbers = #tpu.dot_dimension_numbers<[1], [0], [0], [1], [0, 0, 1, 1], [], []>} : vector<8x32xbf16>, vector<32x32xbf16>, vector<8x32xf32> -> vector<8x32xf32>
    %cst_13 = arith.constant dense<0.000000e+00> : vector<8xf32>
    %18 = vector.multi_reduction <add>, %17, %cst_13 [1] : vector<8x32xf32> to vector<8xf32>
    %19 = vector.shape_cast %18 : vector<8xf32> to vector<8x1xf32>
    %cst_14 = arith.constant 3.200000e+01 : f32
    %20 = vector.broadcast %cst_14 : f32 to vector<8x1xf32>
    %21 = arith.divf %19, %20 : vector<8x1xf32>
    %22 = vector.broadcast %21 : vector<8x1xf32> to vector<8x32xf32>
    %23 = arith.subf %17, %22 : vector<8x32xf32>
    %24 = arith.mulf %23, %23 : vector<8x32xf32>
    %cst_15 = arith.constant dense<0.000000e+00> : vector<8xf32>
    %25 = vector.multi_reduction <add>, %24, %cst_15 [1] : vector<8x32xf32> to vector<8xf32>
    %26 = vector.shape_cast %25 : vector<8xf32> to vector<8x1xf32>
    %cst_16 = arith.constant 3.200000e+01 : f32
    %27 = vector.broadcast %cst_16 : f32 to vector<8x1xf32>
    %28 = arith.divf %26, %27 : vector<8x1xf32>
    %29 = vector.broadcast %21 : vector<8x1xf32> to vector<8x32xf32>
    %30 = arith.subf %17, %29 : vector<8x32xf32>
    %cst_17 = arith.constant 9.99999974E-6 : f32
    %31 = vector.broadcast %cst_17 : f32 to vector<8x1xf32>
    %32 = arith.addf %28, %31 : vector<8x1xf32>
    %33 = math.rsqrt %32 : vector<8x1xf32>
    %34 = vector.broadcast %33 : vector<8x1xf32> to vector<8x32xf32>
    %35 = arith.mulf %30, %34 : vector<8x32xf32>
    %c0_18 = arith.constant 0 : index
    %c0_19 = arith.constant 0 : index
    %36 = vector.load %arg7[%c0_18, %c0_19] : memref<1x32xf32, #tpu.memory_space<vmem>>, vector<1x32xf32>
    %37 = vector.broadcast %36 : vector<1x32xf32> to vector<8x32xf32>
    %38 = arith.mulf %35, %37 : vector<8x32xf32>
    %c0_20 = arith.constant 0 : index
    %c0_21 = arith.constant 0 : index
    %39 = vector.load %arg8[%c0_20, %c0_21] : memref<1x32xf32, #tpu.memory_space<vmem>>, vector<1x32xf32>
    %40 = vector.broadcast %39 : vector<1x32xf32> to vector<8x32xf32>
    %41 = arith.addf %38, %40 : vector<8x32xf32>
    %c0_22 = arith.constant 0 : index
    %c0_23 = arith.constant 0 : index
    %42 = vector.load %arg12[%c0_22, %c0_23] : memref<8x32xf32, #tpu.memory_space<vmem>>, vector<8x32xf32>
    tpu.vector_store %arg12[%c0_22, %c0_23], %41 {strides = array<i32>} : memref<8x32xf32, #tpu.memory_space<vmem>>, vector<8x32xf32>,
    %43 = arith.truncf %41 : vector<8x32xf32> to vector<8x32xbf16>
    %c0_24 = arith.constant 0 : index
    %c0_25 = arith.constant 0 : index
    %c0_26 = arith.constant 0 : index
    %44 = vector.load %arg9[%c0_24, %c0_25, %c0_26] : memref<4x32x32xbf16, #tpu.memory_space<vmem>>, vector<1x32x32xbf16>
    %45 = vector.shape_cast %44 : vector<1x32x32xbf16> to vector<32x32xbf16>
    %cst_27 = arith.constant dense<0.000000e+00> : vector<8x32xf32>
    %46 = tpu.matmul %43, %45, %cst_27 {dimension_numbers = #tpu.dot_dimension_numbers<[1], [0], [0], [1], [0, 0, 1, 1], [], []>} : vector<8x32xbf16>, vector<32x32xbf16>, vector<8x32xf32> -> vector<8x32xf32>
    %c1 = arith.constant 1 : index
    %c0_28 = arith.constant 0 : index
    %c0_29 = arith.constant 0 : index
    %47 = vector.load %arg9[%c1, %c0_28, %c0_29] : memref<4x32x32xbf16, #tpu.memory_space<vmem>>, vector<1x32x32xbf16>
    %48 = vector.shape_cast %47 : vector<1x32x32xbf16> to vector<32x32xbf16>
    %cst_30 = arith.constant dense<0.000000e+00> : vector<8x32xf32>
    %49 = tpu.matmul %43, %48, %cst_30 {dimension_numbers = #tpu.dot_dimension_numbers<[1], [0], [0], [1], [0, 0, 1, 1], [], []>} : vector<8x32xbf16>, vector<32x32xbf16>, vector<8x32xf32> -> vector<8x32xf32>
    %c2 = arith.constant 2 : index
    %c0_31 = arith.constant 0 : index
    %c0_32 = arith.constant 0 : index
    %50 = vector.load %arg9[%c2, %c0_31, %c0_32] : memref<4x32x32xbf16, #tpu.memory_space<vmem>>, vector<1x32x32xbf16>
    %51 = vector.shape_cast %50 : vector<1x32x32xbf16> to vector<32x32xbf16>
    %cst_33 = arith.constant dense<0.000000e+00> : vector<8x32xf32>
    %52 = tpu.matmul %43, %51, %cst_33 {dimension_numbers = #tpu.dot_dimension_numbers<[1], [0], [0], [1], [0, 0, 1, 1], [], []>} : vector<8x32xbf16>, vector<32x32xbf16>, vector<8x32xf32> -> vector<8x32xf32>
    %c3 = arith.constant 3 : index
    %c0_34 = arith.constant 0 : index
    %c0_35 = arith.constant 0 : index
    %53 = vector.load %arg9[%c3, %c0_34, %c0_35] : memref<4x32x32xbf16, #tpu.memory_space<vmem>>, vector<1x32x32xbf16>
    %54 = vector.shape_cast %53 : vector<1x32x32xbf16> to vector<32x32xbf16>
    %cst_36 = arith.constant dense<0.000000e+00> : vector<8x32xf32>
    %55 = tpu.matmul %43, %54, %cst_36 {dimension_numbers = #tpu.dot_dimension_numbers<[1], [0], [0], [1], [0, 0, 1, 1], [], []>} : vector<8x32xbf16>, vector<32x32xbf16>, vector<8x32xf32> -> vector<8x32xf32>
    %cst_37 = arith.constant dense<0.000000e+00> : vector<8xf32>
    %56 = vector.multi_reduction <add>, %46, %cst_37 [1] : vector<8x32xf32> to vector<8xf32>
    %57 = vector.shape_cast %56 : vector<8xf32> to vector<8x1xf32>
    %cst_38 = arith.constant 0.000000e+00 : f32
    %58 = vector.broadcast %cst_38 : f32 to vector<8x1xf32>
    %59 = arith.addf %58, %57 : vector<8x1xf32>
    %cst_39 = arith.constant dense<0.000000e+00> : vector<8xf32>
    %60 = vector.multi_reduction <add>, %49, %cst_39 [1] : vector<8x32xf32> to vector<8xf32>
    %61 = vector.shape_cast %60 : vector<8xf32> to vector<8x1xf32>
    %62 = arith.addf %59, %61 : vector<8x1xf32>
    %cst_40 = arith.constant dense<0.000000e+00> : vector<8xf32>
    %63 = vector.multi_reduction <add>, %52, %cst_40 [1] : vector<8x32xf32> to vector<8xf32>
    %64 = vector.shape_cast %63 : vector<8xf32> to vector<8x1xf32>
    %65 = arith.addf %62, %64 : vector<8x1xf32>
    %cst_41 = arith.constant dense<0.000000e+00> : vector<8xf32>
    %66 = vector.multi_reduction <add>, %55, %cst_41 [1] : vector<8x32xf32> to vector<8xf32>
    %67 = vector.shape_cast %66 : vector<8xf32> to vector<8x1xf32>
    %68 = arith.addf %65, %67 : vector<8x1xf32>
    %cst_42 = arith.constant 7.812500e-03 : f32
    %69 = vector.broadcast %cst_42 : f32 to vector<8x1xf32>
    %70 = arith.mulf %68, %69 : vector<8x1xf32>
    %71 = vector.broadcast %70 : vector<8x1xf32> to vector<8x32xf32>
    %72 = arith.subf %46, %71 : vector<8x32xf32>
    %73 = arith.mulf %72, %72 : vector<8x32xf32>
    %cst_43 = arith.constant dense<0.000000e+00> : vector<8xf32>
    %74 = vector.multi_reduction <add>, %73, %cst_43 [1] : vector<8x32xf32> to vector<8xf32>
    %75 = vector.shape_cast %74 : vector<8xf32> to vector<8x1xf32>
    %cst_44 = arith.constant 0.000000e+00 : f32
    %76 = vector.broadcast %cst_44 : f32 to vector<8x1xf32>
    %77 = arith.addf %76, %75 : vector<8x1xf32>
    %78 = vector.broadcast %70 : vector<8x1xf32> to vector<8x32xf32>
    %79 = arith.subf %49, %78 : vector<8x32xf32>
    %80 = arith.mulf %79, %79 : vector<8x32xf32>
    %cst_45 = arith.constant dense<0.000000e+00> : vector<8xf32>
    %81 = vector.multi_reduction <add>, %80, %cst_45 [1] : vector<8x32xf32> to vector<8xf32>
    %82 = vector.shape_cast %81 : vector<8xf32> to vector<8x1xf32>
    %83 = arith.addf %77, %82 : vector<8x1xf32>
    %84 = vector.broadcast %70 : vector<8x1xf32> to vector<8x32xf32>
    %85 = arith.subf %52, %84 : vector<8x32xf32>
    %86 = arith.mulf %85, %85 : vector<8x32xf32>
    %cst_46 = arith.constant dense<0.000000e+00> : vector<8xf32>
    %87 = vector.multi_reduction <add>, %86, %cst_46 [1] : vector<8x32xf32> to vector<8xf32>
    %88 = vector.shape_cast %87 : vector<8xf32> to vector<8x1xf32>
    %89 = arith.addf %83, %88 : vector<8x1xf32>
    %90 = vector.broadcast %70 : vector<8x1xf32> to vector<8x32xf32>
    %91 = arith.subf %55, %90 : vector<8x32xf32>
    %92 = arith.mulf %91, %91 : vector<8x32xf32>
    %cst_47 = arith.constant dense<0.000000e+00> : vector<8xf32>
    %93 = vector.multi_reduction <add>, %92, %cst_47 [1] : vector<8x32xf32> to vector<8xf32>
    %94 = vector.shape_cast %93 : vector<8xf32> to vector<8x1xf32>
    %95 = arith.addf %89, %94 : vector<8x1xf32>
    %cst_48 = arith.constant 7.812500e-03 : f32
    %96 = vector.broadcast %cst_48 : f32 to vector<8x1xf32>
    %97 = arith.mulf %95, %96 : vector<8x1xf32>
    %cst_49 = arith.constant 9.99999974E-6 : f32
    %98 = vector.broadcast %cst_49 : f32 to vector<8x1xf32>
    %99 = arith.addf %97, %98 : vector<8x1xf32>
    %100 = math.rsqrt %99 : vector<8x1xf32>
    %101 = vector.broadcast %70 : vector<8x1xf32> to vector<8x32xf32>
    %102 = arith.subf %46, %101 : vector<8x32xf32>
    %103 = vector.broadcast %100 : vector<8x1xf32> to vector<8x32xf32>
    %104 = arith.mulf %102, %103 : vector<8x32xf32>
    %c0_50 = arith.constant 0 : index
    %c0_51 = arith.constant 0 : index
    %c0_52 = arith.constant 0 : index
    %105 = vector.load %arg10[%c0_50, %c0_51, %c0_52] : memref<4x1x32xf32, #tpu.memory_space<vmem>>, vector<1x1x32xf32>
    %106 = vector.shape_cast %105 : vector<1x1x32xf32> to vector<1x32xf32>
    %107 = vector.broadcast %106 : vector<1x32xf32> to vector<8x32xf32>
    %108 = arith.mulf %104, %107 : vector<8x32xf32>
    %c0_53 = arith.constant 0 : index
    %c0_54 = arith.constant 0 : index
    %c0_55 = arith.constant 0 : index
    %109 = vector.load %arg11[%c0_53, %c0_54, %c0_55] : memref<4x1x32xf32, #tpu.memory_space<vmem>>, vector<1x1x32xf32>
    %110 = vector.shape_cast %109 : vector<1x1x32xf32> to vector<1x32xf32>
    %111 = vector.broadcast %110 : vector<1x32xf32> to vector<8x32xf32>
    %112 = arith.addf %108, %111 : vector<8x32xf32>
    %113 = arith.truncf %112 : vector<8x32xf32> to vector<8x32xbf16>
    %c0_56 = arith.constant 0 : index
    %c0_57 = arith.constant 0 : index
    %c0_58 = arith.constant 0 : index
    %114 = vector.load %arg13[%c0_56, %c0_57, %c0_58] : memref<4x8x32xbf16, #tpu.memory_space<vmem>>, vector<1x8x32xbf16>
    %115 = vector.shape_cast %114 : vector<1x8x32xbf16> to vector<8x32xbf16>
    %116 = vector.shape_cast %113 : vector<8x32xbf16> to vector<1x8x32xbf16>
    tpu.vector_store %arg13[%c0_56, %c0_57, %c0_58], %116 {strides = array<i32>} : memref<4x8x32xbf16, #tpu.memory_space<vmem>>, vector<1x8x32xbf16>,
    %117 = vector.broadcast %70 : vector<8x1xf32> to vector<8x32xf32>
    %118 = arith.subf %49, %117 : vector<8x32xf32>
    %119 = vector.broadcast %100 : vector<8x1xf32> to vector<8x32xf32>
    %120 = arith.mulf %118, %119 : vector<8x32xf32>
    %c1_59 = arith.constant 1 : index
    %c0_60 = arith.constant 0 : index
    %c0_61 = arith.constant 0 : index
    %121 = vector.load %arg10[%c1_59, %c0_60, %c0_61] : memref<4x1x32xf32, #tpu.memory_space<vmem>>, vector<1x1x32xf32>
    %122 = vector.shape_cast %121 : vector<1x1x32xf32> to vector<1x32xf32>
    %123 = vector.broadcast %122 : vector<1x32xf32> to vector<8x32xf32>
    %124 = arith.mulf %120, %123 : vector<8x32xf32>
    %c1_62 = arith.constant 1 : index
    %c0_63 = arith.constant 0 : index
    %c0_64 = arith.constant 0 : index
    %125 = vector.load %arg11[%c1_62, %c0_63, %c0_64] : memref<4x1x32xf32, #tpu.memory_space<vmem>>, vector<1x1x32xf32>
    %126 = vector.shape_cast %125 : vector<1x1x32xf32> to vector<1x32xf32>
    %127 = vector.broadcast %126 : vector<1x32xf32> to vector<8x32xf32>
    %128 = arith.addf %124, %127 : vector<8x32xf32>
    %129 = arith.truncf %128 : vector<8x32xf32> to vector<8x32xbf16>
    %c1_65 = arith.constant 1 : index
    %c0_66 = arith.constant 0 : index
    %c0_67 = arith.constant 0 : index
    %130 = vector.load %arg13[%c1_65, %c0_66, %c0_67] : memref<4x8x32xbf16, #tpu.memory_space<vmem>>, vector<1x8x32xbf16>
    %131 = vector.shape_cast %130 : vector<1x8x32xbf16> to vector<8x32xbf16>
    %132 = vector.shape_cast %129 : vector<8x32xbf16> to vector<1x8x32xbf16>
    tpu.vector_store %arg13[%c1_65, %c0_66, %c0_67], %132 {strides = array<i32>} : memref<4x8x32xbf16, #tpu.memory_space<vmem>>, vector<1x8x32xbf16>,
    %133 = vector.broadcast %70 : vector<8x1xf32> to vector<8x32xf32>
    %134 = arith.subf %52, %133 : vector<8x32xf32>
    %135 = vector.broadcast %100 : vector<8x1xf32> to vector<8x32xf32>
    %136 = arith.mulf %134, %135 : vector<8x32xf32>
    %c2_68 = arith.constant 2 : index
    %c0_69 = arith.constant 0 : index
    %c0_70 = arith.constant 0 : index
    %137 = vector.load %arg10[%c2_68, %c0_69, %c0_70] : memref<4x1x32xf32, #tpu.memory_space<vmem>>, vector<1x1x32xf32>
    %138 = vector.shape_cast %137 : vector<1x1x32xf32> to vector<1x32xf32>
    %139 = vector.broadcast %138 : vector<1x32xf32> to vector<8x32xf32>
    %140 = arith.mulf %136, %139 : vector<8x32xf32>
    %c2_71 = arith.constant 2 : index
    %c0_72 = arith.constant 0 : index
    %c0_73 = arith.constant 0 : index
    %141 = vector.load %arg11[%c2_71, %c0_72, %c0_73] : memref<4x1x32xf32, #tpu.memory_space<vmem>>, vector<1x1x32xf32>
    %142 = vector.shape_cast %141 : vector<1x1x32xf32> to vector<1x32xf32>
    %143 = vector.broadcast %142 : vector<1x32xf32> to vector<8x32xf32>
    %144 = arith.addf %140, %143 : vector<8x32xf32>
    %145 = arith.truncf %144 : vector<8x32xf32> to vector<8x32xbf16>
    %c2_74 = arith.constant 2 : index
    %c0_75 = arith.constant 0 : index
    %c0_76 = arith.constant 0 : index
    %146 = vector.load %arg13[%c2_74, %c0_75, %c0_76] : memref<4x8x32xbf16, #tpu.memory_space<vmem>>, vector<1x8x32xbf16>
    %147 = vector.shape_cast %146 : vector<1x8x32xbf16> to vector<8x32xbf16>
    %148 = vector.shape_cast %145 : vector<8x32xbf16> to vector<1x8x32xbf16>
    tpu.vector_store %arg13[%c2_74, %c0_75, %c0_76], %148 {strides = array<i32>} : memref<4x8x32xbf16, #tpu.memory_space<vmem>>, vector<1x8x32xbf16>,
    %149 = vector.broadcast %70 : vector<8x1xf32> to vector<8x32xf32>
    %150 = arith.subf %55, %149 : vector<8x32xf32>
    %151 = vector.broadcast %100 : vector<8x1xf32> to vector<8x32xf32>
    %152 = arith.mulf %150, %151 : vector<8x32xf32>
    %c3_77 = arith.constant 3 : index
    %c0_78 = arith.constant 0 : index
    %c0_79 = arith.constant 0 : index
    %153 = vector.load %arg10[%c3_77, %c0_78, %c0_79] : memref<4x1x32xf32, #tpu.memory_space<vmem>>, vector<1x1x32xf32>
    %154 = vector.shape_cast %153 : vector<1x1x32xf32> to vector<1x32xf32>
    %155 = vector.broadcast %154 : vector<1x32xf32> to vector<8x32xf32>
    %156 = arith.mulf %152, %155 : vector<8x32xf32>
    %c3_80 = arith.constant 3 : index
    %c0_81 = arith.constant 0 : index
    %c0_82 = arith.constant 0 : index
    %157 = vector.load %arg11[%c3_80, %c0_81, %c0_82] : memref<4x1x32xf32, #tpu.memory_space<vmem>>, vector<1x1x32xf32>
    %158 = vector.shape_cast %157 : vector<1x1x32xf32> to vector<1x32xf32>
    %159 = vector.broadcast %158 : vector<1x32xf32> to vector<8x32xf32>
    %160 = arith.addf %156, %159 : vector<8x32xf32>
    %161 = arith.truncf %160 : vector<8x32xf32> to vector<8x32xbf16>
    %c3_83 = arith.constant 3 : index
    %c0_84 = arith.constant 0 : index
    %c0_85 = arith.constant 0 : index
    %162 = vector.load %arg13[%c3_83, %c0_84, %c0_85] : memref<4x8x32xbf16, #tpu.memory_space<vmem>>, vector<1x8x32xbf16>
    %163 = vector.shape_cast %162 : vector<1x8x32xbf16> to vector<8x32xbf16>
    %164 = vector.shape_cast %161 : vector<8x32xbf16> to vector<1x8x32xbf16>
    tpu.vector_store %arg13[%c3_83, %c0_84, %c0_85], %164 {strides = array<i32>} : memref<4x8x32xbf16, #tpu.memory_space<vmem>>, vector<1x8x32xbf16>,
    return
  }
  func.func @transform_0(%arg0: i32) -> (i32, i32) {
    %c0_i32 = arith.constant 0 : i32
    %c0_i32_0 = arith.constant 0 : i32
    return %arg0, %c0_i32 : i32, i32
  }
  func.func @transform_1(%arg0: i32) -> (i32, i32) {
    %c0_i32 = arith.constant 0 : i32
    %c0_i32_0 = arith.constant 0 : i32
    return %arg0, %c0_i32 : i32, i32
  }
  func.func @transform_2(%arg0: i32) -> (i32, i32) {
    %c0_i32 = arith.constant 0 : i32
    %c0_i32_0 = arith.constant 0 : i32
    %c0_i32_1 = arith.constant 0 : i32
    return %c0_i32, %c0_i32_0 : i32, i32
  }
  func.func @transform_3(%arg0: i32) -> (i32, i32) {
    %c0_i32 = arith.constant 0 : i32
    %c0_i32_0 = arith.constant 0 : i32
    %c0_i32_1 = arith.constant 0 : i32
    return %c0_i32, %c0_i32_0 : i32, i32
  }
  func.func @transform_4(%arg0: i32) -> (i32, i32) {
    %c0_i32 = arith.constant 0 : i32
    %c0_i32_0 = arith.constant 0 : i32
    %c0_i32_1 = arith.constant 0 : i32
    return %c0_i32, %c0_i32_0 : i32, i32
  }
  func.func @transform_5(%arg0: i32) -> (i32, i32) {
    %c0_i32 = arith.constant 0 : i32
    %c0_i32_0 = arith.constant 0 : i32
    %c0_i32_1 = arith.constant 0 : i32
    return %c0_i32, %c0_i32_0 : i32, i32
  }
  func.func @transform_6(%arg0: i32) -> (i32, i32) {
    %c0_i32 = arith.constant 0 : i32
    %c0_i32_0 = arith.constant 0 : i32
    %c0_i32_1 = arith.constant 0 : i32
    return %c0_i32, %c0_i32_0 : i32, i32
  }
  func.func @transform_7(%arg0: i32) -> (i32, i32) {
    %c0_i32 = arith.constant 0 : i32
    %c0_i32_0 = arith.constant 0 : i32
    %c0_i32_1 = arith.constant 0 : i32
    return %c0_i32, %c0_i32_0 : i32, i32
  }
  func.func @transform_8(%arg0: i32) -> (i32, i32, i32) {
    %c0_i32 = arith.constant 0 : i32
    %c0_i32_0 = arith.constant 0 : i32
    %c0_i32_1 = arith.constant 0 : i32
    %c0_i32_2 = arith.constant 0 : i32
    return %c0_i32, %c0_i32_0, %c0_i32_1 : i32, i32, i32
  }
  func.func @transform_9(%arg0: i32) -> (i32, i32, i32) {
    %c0_i32 = arith.constant 0 : i32
    %c0_i32_0 = arith.constant 0 : i32
    %c0_i32_1 = arith.constant 0 : i32
    %c0_i32_2 = arith.constant 0 : i32
    return %c0_i32, %c0_i32_0, %c0_i32_1 : i32, i32, i32
  }
  func.func @transform_10(%arg0: i32) -> (i32, i32, i32) {
    %c0_i32 = arith.constant 0 : i32
    %c0_i32_0 = arith.constant 0 : i32
    %c0_i32_1 = arith.constant 0 : i32
    %c0_i32_2 = arith.constant 0 : i32
    return %c0_i32, %c0_i32_0, %c0_i32_1 : i32, i32, i32
  }
  func.func @transform_11(%arg0: i32) -> (i32, i32) {
    %c0_i32 = arith.constant 0 : i32
    %c0_i32_0 = arith.constant 0 : i32
    return %arg0, %c0_i32 : i32, i32
  }
  func.func @transform_12(%arg0: i32) -> (i32, i32, i32) {
    %c0_i32 = arith.constant 0 : i32
    %c0_i32_0 = arith.constant 0 : i32
    %c0_i32_1 = arith.constant 0 : i32
    return %c0_i32, %arg0, %c0_i32_0 : i32, i32, i32
  }
}

module attributes {stable_mosaic.version = 11 : i64} {
  func.func @agg_kernel(%arg0: i32, %arg1: i32, %arg2: memref<128x32xbf16, #tpu.memory_space<vmem>>, %arg3: memref<1x128xi32, #tpu.memory_space<vmem>>, %arg4: memref<8x32xf32, #tpu.memory_space<vmem>>, %arg5: memref<8x1xf32, #tpu.memory_space<vmem>>) attributes {dimension_semantics = [#tpu.dimension_semantics<parallel>, #tpu.dimension_semantics<arbitrary>], iteration_bounds = array<i64: 1, 1>, scalar_prefetch = 0 : i64, scratch_operands = 1 : i64, tpu.core_type = #tpu.core_type<tc>, window_params = [{transform_indices = @transform_0, window_bounds = array<i64: 128, 32>}, {transform_indices = @transform_1, window_bounds = array<i64: 1, 128>}, {transform_indices = @transform_2, window_bounds = array<i64: 8, 32>}]} {
    %c0_i32 = arith.constant 0 : i32
    %0 = arith.cmpi eq, %arg1, %c0_i32 : i32
    %1 = arith.extui %0 : i1 to i32
    %c0_i32_0 = arith.constant 0 : i32
    %2 = arith.cmpi ne, %1, %c0_i32_0 : i32
    scf.if %2 {
      %cst_15 = arith.constant 0.000000e+00 : f32
      %28 = vector.broadcast %cst_15 : f32 to vector<8x32xf32>
      %c0_16 = arith.constant 0 : index
      %c0_17 = arith.constant 0 : index
      %29 = vector.load %arg4[%c0_16, %c0_17] : memref<8x32xf32, #tpu.memory_space<vmem>>, vector<8x32xf32>
      tpu.vector_store %arg4[%c0_16, %c0_17], %28 {strides = array<i32>} : memref<8x32xf32, #tpu.memory_space<vmem>>, vector<8x32xf32>,
      %cst_18 = arith.constant 0.000000e+00 : f32
      %30 = vector.broadcast %cst_18 : f32 to vector<8x1xf32>
      %c0_19 = arith.constant 0 : index
      %c0_20 = arith.constant 0 : index
      %31 = vector.load %arg5[%c0_19, %c0_20] : memref<8x1xf32, #tpu.memory_space<vmem>>, vector<8x1xf32>
      tpu.vector_store %arg5[%c0_19, %c0_20], %30 {strides = array<i32>} : memref<8x1xf32, #tpu.memory_space<vmem>>, vector<8x1xf32>,
    } else {
    }
    %c8_i32 = arith.constant 8 : i32
    %3 = arith.muli %arg0, %c8_i32 : i32
    %4 = tpu.iota {dimensions = array<i32: 0>} : vector<8x128xi32>
    %5 = vector.broadcast %3 : i32 to vector<8x128xi32>
    %6 = arith.addi %4, %5 : vector<8x128xi32>
    %c0 = arith.constant 0 : index
    %c0_1 = arith.constant 0 : index
    %7 = vector.load %arg3[%c0, %c0_1] : memref<1x128xi32, #tpu.memory_space<vmem>>, vector<1x128xi32>
    %8 = vector.broadcast %7 : vector<1x128xi32> to vector<8x128xi32>
    %9 = arith.cmpi eq, %6, %8 : vector<8x128xi32>
    %c0_2 = arith.constant 0 : index
    %c0_3 = arith.constant 0 : index
    %10 = vector.load %arg4[%c0_2, %c0_3] : memref<8x32xf32, #tpu.memory_space<vmem>>, vector<8x32xf32>
    %11 = arith.extui %9 : vector<8x128xi1> to vector<8x128xi32>
    %12 = arith.sitofp %11 : vector<8x128xi32> to vector<8x128xf32>
    %13 = arith.truncf %12 : vector<8x128xf32> to vector<8x128xbf16>
    %c0_4 = arith.constant 0 : index
    %c0_5 = arith.constant 0 : index
    %14 = vector.load %arg2[%c0_4, %c0_5] : memref<128x32xbf16, #tpu.memory_space<vmem>>, vector<128x32xbf16>
    %cst = arith.constant dense<0.000000e+00> : vector<8x32xf32>
    %15 = tpu.matmul %13, %14, %cst {dimension_numbers = #tpu.dot_dimension_numbers<[1], [0], [0], [1], [0, 0, 1, 1], [], []>} : vector<8x128xbf16>, vector<128x32xbf16>, vector<8x32xf32> -> vector<8x32xf32>
    %16 = arith.addf %10, %15 : vector<8x32xf32>
    %c0_6 = arith.constant 0 : index
    %c0_7 = arith.constant 0 : index
    %17 = vector.load %arg4[%c0_6, %c0_7] : memref<8x32xf32, #tpu.memory_space<vmem>>, vector<8x32xf32>
    tpu.vector_store %arg4[%c0_6, %c0_7], %16 {strides = array<i32>} : memref<8x32xf32, #tpu.memory_space<vmem>>, vector<8x32xf32>,
    %c0_8 = arith.constant 0 : index
    %c0_9 = arith.constant 0 : index
    %18 = vector.load %arg5[%c0_8, %c0_9] : memref<8x1xf32, #tpu.memory_space<vmem>>, vector<8x1xf32>
    %19 = arith.extui %9 : vector<8x128xi1> to vector<8x128xi32>
    %20 = arith.sitofp %19 : vector<8x128xi32> to vector<8x128xf32>
    %cst_10 = arith.constant dense<0.000000e+00> : vector<8xf32>
    %21 = vector.multi_reduction <add>, %20, %cst_10 [1] : vector<8x128xf32> to vector<8xf32>
    %22 = vector.shape_cast %21 : vector<8xf32> to vector<8x1xf32>
    %23 = arith.addf %18, %22 : vector<8x1xf32>
    %c0_11 = arith.constant 0 : index
    %c0_12 = arith.constant 0 : index
    %24 = vector.load %arg5[%c0_11, %c0_12] : memref<8x1xf32, #tpu.memory_space<vmem>>, vector<8x1xf32>
    tpu.vector_store %arg5[%c0_11, %c0_12], %23 {strides = array<i32>} : memref<8x1xf32, #tpu.memory_space<vmem>>, vector<8x1xf32>,
    %c0_i32_13 = arith.constant 0 : i32
    %25 = arith.cmpi eq, %arg1, %c0_i32_13 : i32
    %26 = arith.extui %25 : i1 to i32
    %c0_i32_14 = arith.constant 0 : i32
    %27 = arith.cmpi ne, %26, %c0_i32_14 : i32
    scf.if %27 {
      %c0_15 = arith.constant 0 : index
      %c0_16 = arith.constant 0 : index
      %28 = vector.load %arg4[%c0_15, %c0_16] : memref<8x32xf32, #tpu.memory_space<vmem>>, vector<8x32xf32>
      %c0_17 = arith.constant 0 : index
      %c0_18 = arith.constant 0 : index
      %29 = vector.load %arg5[%c0_17, %c0_18] : memref<8x1xf32, #tpu.memory_space<vmem>>, vector<8x1xf32>
      %cst_19 = arith.constant 1.000000e+00 : f32
      %30 = vector.broadcast %cst_19 : f32 to vector<8x1xf32>
      %31 = arith.maximumf %29, %30 : vector<8x1xf32>
      %32 = tpu.reciprocal %31 {approx = true} : vector<8x1xf32> -> vector<8x1xf32>
      %33 = vector.broadcast %32 : vector<8x1xf32> to vector<8x32xf32>
      %34 = arith.mulf %28, %33 : vector<8x32xf32>
      %c0_20 = arith.constant 0 : index
      %c0_21 = arith.constant 0 : index
      %35 = vector.load %arg4[%c0_20, %c0_21] : memref<8x32xf32, #tpu.memory_space<vmem>>, vector<8x32xf32>
      tpu.vector_store %arg4[%c0_20, %c0_21], %34 {strides = array<i32>} : memref<8x32xf32, #tpu.memory_space<vmem>>, vector<8x32xf32>,
    } else {
    }
    return
  }
  func.func @transform_0(%arg0: i32, %arg1: i32) -> (i32, i32) {
    %c0_i32 = arith.constant 0 : i32
    %c0_i32_0 = arith.constant 0 : i32
    return %arg1, %c0_i32 : i32, i32
  }
  func.func @transform_1(%arg0: i32, %arg1: i32) -> (i32, i32) {
    %c0_i32 = arith.constant 0 : i32
    %c0_i32_0 = arith.constant 0 : i32
    return %c0_i32, %arg1 : i32, i32
  }
  func.func @transform_2(%arg0: i32, %arg1: i32) -> (i32, i32) {
    %c0_i32 = arith.constant 0 : i32
    %c0_i32_0 = arith.constant 0 : i32
    return %arg0, %c0_i32 : i32, i32
  }
}

</mosaic_0001>

<bundles_post_ra>
// kernel: val2cst_forward.3
= control target key start
LH: loop header
LB: loop body
LE: loop exit
PB: predicated region body
PF: predicated region fallthrough
CT: control target
= control target key end

     0   :  { %vm18_vm0 = vcmask 7168   ;;  %v21_v0 = vlaneseq  ;;  %vm16_vm1 = vcmask 261120   ;;  %v225_v2 = vmov 0.0   ;;  %s282_s0 = inlined_call_operand.vmem [shape: bf16[128,32], index: 0, kind: input, shape index: {}]   ;;  %s283_s1 = inlined_call_operand.vmem [shape: s32[1,128], index: 1, kind: input, shape index: {}]   ;;  %s284_s2 = inlined_call_operand.hbm [shape: f32[8,32], index: 2, kind: output, shape index: {}]  }
   0x1   :  { %v196_v1 = vld [vmem:[%s283_s1] ss:$0 sm:$0xff]  ;;  %19 = vst.msk [vmem:[#allocation2] sm:$0xff] %vm18_vm0, %v225_v2  ;;  %v190_v3 = vld [vmem:[%s282_s0 + $0x38] sm:$0xff]  ;;  %v189_v5 = vld [vmem:[%s282_s0 + $0x30] sm:$0xff] }
   0x2   :  { %v22_v4 = vshrl.u32 %v21_v0, 7  ;;  %17 = vst.msk [vmem:[#allocation3] sm:$0xff] %vm16_vm1, %v225_v2  ;;  %96 = vmatpush.bf16.msra.mxu0 %v190_v3 }
   0x3   :  { %7 = vsyncpa [#allocation4], 0  ;;  %v188_v7 = vld [vmem:[%s282_s0 + $0x28] sm:$0xff]  ;;  %v187_v8 = vld [vmem:[%s282_s0 + $0x20] sm:$0xff]  ;;  %v226_v13 = vmov 1.0|1.0  }
   0x4   :  { %vm27_vm2 = vcmp.eq.s32.totalorder %v22_v4, %v196_v1  ;;  %v186_v9 = vld [vmem:[%s282_s0 + $0x18] sm:$0xff]  ;;  %v185_v10 = vld [vmem:[%s282_s0 + $0x10] sm:$0xff]  ;;  %v184_v11 = vld [vmem:[%s282_s0 + $0x8] sm:$0xff]  ;;  %v227_v14 = vmov 0   ;;  %s139_s29 = sshll.u32 %s284_s2, 4  ;;  %s140_s29 = int_to_ptr.hbm [resolvable:$true] %s139_s29 }
   0x5   :  { %v148_v6 = vsel %vm27_vm2, 1.0, %v225_v2  ;;  %v183_v12 = vld [vmem:[%s282_s0] sm:$0xff]  ;;  %vm181_vm3 = vmpackc.low %vm27_vm2, %vm27_vm2  ;;  %195 = vset.pattern.permute.xlu0 %v227_v14  ;;  %s228_s0 = smov [#allocation3]  }
   0x6   :  { %113 = vadd.xlane.f32.xlu0 %v148_v6  ;;  %97 = vmatpush.bf16.msra.mxu0 %v189_v5  ;;  %s137_s26 = sshll.u32 %s228_s0, 4  ;;  %s138_s26 = int_to_ptr.vmem [resolvable:$true] %s137_s26 }
   0x8   :  { %v112_v15 = vld [vmem:[#allocation2] sm:$0xff] }
   0x9   :  { %v28_v21 = vld [vmem:[#allocation3] sm:$0xff] }
   0xa   :  { %98 = vmatpush.bf16.msra.mxu0 %v188_v7 }
   0xe   :  { %99 = vmatpush.bf16.msra.mxu0 %v187_v8 }
  0x12   :  { %100 = vmatpush.bf16.msra.mxu0 %v186_v9 }
  0x16   :  { %101 = vmatpush.bf16.msra.mxu0 %v185_v10 }
  0x1a   :  { %102 = vmatpush.bf16.msra.mxu0 %v184_v11 }
  0x1e   :  { %103 = vmatpush.bf16.msra.mxu0 %v183_v12 }
  0x21   :  { %182 = vmatmul.msk.bf16.vlgmr.msra.gmra.mxu0 %vm181_vm3, %v226_v13 }
  0x79   :  { %v114_v16 = vpop.xlane.xlu0 %113 }
  0x7a   :  { %v115_v17 = vadd.f32 %v114_v16, %v112_v15 }
  0x7c   :  { %117 = vst.msk [vmem:[#allocation2] sm:$0xff] %vm18_vm0, %v115_v17 }
  0x83   :  { %v122_v18 = vld [vmem:[#allocation2] sm:$0xff] }
  0x84   :  { %v123_v19 = vmax.f32 %v122_v18, 1.0 }
  0x86   :  { %197 = vrcp.f32 %v123_v19 }
  0x8c   :  { %v198_v20 = vpop.eup %197 }
  0x8d   :  { %127 = vperm.xlu0 %195, %v198_v20  }
  0x9e   :  { %v105_v22 = vpop.f32.mrf.mxu0 }
  0x9f   :  { %v109_v23 = vadd.f32 %v105_v22, %v28_v21 }
  0xa1   :  { %111 = vst.msk [vmem:[#allocation3] sm:$0xff] %vm16_vm1, %v109_v23 }
  0xa6   :  { %v107_v24 = vpop.f32.mrf.mxu0 }
  0xa8   :  { %v121_v25 = vld [vmem:[#allocation3] sm:$0xff] }
  0xff   :  { %v128_v26 = vpop.permute.xlu0 %127 }
 0x100   :  { %v130_v27 = vmul.f32 %v128_v26, %v121_v25 }
 0x102   :  { %131 = vst.msk [vmem:[#allocation3] sm:$0xff] %vm16_vm1, %v130_v27 }
 0x103   :  { %142 = dma.vmem_to_hbm [thread:$0]  %s138_s26, 128, %s140_s29, [#allocation4]  }
 0x104   :  { %223 = dma.done.wait [#allocation4], 128  }
 0x105   :  { %224 = vsyncadd [#allocation4], 4294967168 }
 0x106   :  { %147 = vsyncpa [#allocation4], 1 }

// kernel: val2cst_forward.2
= control target key start
LH: loop header
LB: loop body
LE: loop exit
PB: predicated region body
PF: predicated region fallthrough
CT: control target
= control target key end

     0   :  { %v560_v3 = vmov 0   ;;  %s738_s0 = inlined_call_operand.vmem [shape: f32[8,32], index: 0, kind: input, shape index: {}]   ;;  %s739_s1 = inlined_call_operand.vmem [shape: f32[8,1], index: 1, kind: input, shape index: {}]   ;;  %s740_s2 = inlined_call_operand.vmem [shape: bf16[32,32], index: 2, kind: input, shape index: {}]   ;;  %s741_s3 = inlined_call_operand.vmem [shape: f32[1,32], index: 3, kind: input, shape index: {}]   ;;  %s742_s4 = inlined_call_operand.vmem [shape: f32[1,32], index: 4, kind: input, shape index: {}]   ;;  %s743_s5 = inlined_call_operand.vmem [shape: bf16[32,32], index: 5, kind: input, shape index: {}]   ;;  %s744_s6 = inlined_call_operand.vmem [shape: f32[1,32], index: 6, kind: input, shape index: {}]   ;;  %s745_s7 = inlined_call_operand.vmem [shape: f32[1,32], index: 7, kind: input, shape index: {}]   ;;  %s746_s8 = inlined_call_operand.vmem [shape: bf16[4,32,32], index: 8, kind: input, shape index: {}]   ;;  %s747_s9 = inlined_call_operand.vmem [shape: f32[4,1,32], index: 9, kind: input, shape index: {}]   ;;  %s748_s10 = inlined_call_operand.vmem [shape: f32[4,1,32], index: 10, kind: input, shape index: {}]   ;;  %s749_s11 = inlined_call_operand.hbm [shape: f32[8,32], index: 11, kind: output, shape index: {0}]   ;;  %s750_s12 = inlined_call_operand.vmem [shape: bf16[4,8,32], index: 12, kind: output, shape index: {1}]  }
   0x1   :  { %v501_v0 = vld [vmem:[%s740_s2 + $0x8] sm:$0xff]  ;;  %v500_v1 = vld [vmem:[%s740_s2] sm:$0xff]  ;;  %515 = vset.pattern.permute.xlu0 %v560_v3 }
   0x2   :  { %v42_v2 = vld [vmem:[%s738_s0] sm:$0xff]  ;;  %81 = vmatpush.bf16.msra.mxu0 %v501_v0 }
   0x3   :  { %v48_v4 = vld [vmem:[%s739_s1] sm:$0xff]  ;;  %v43_v5 = vpack.c.bf16 %v42_v2, %v42_v2 }
   0x4   :  { %52 = vperm.xlu0 %515, %v48_v4  }
   0x5   :  { %18 = vsyncpa [#allocation3], 0  ;;  %vm71_vm0 = vcmask 261120   ;;  %v503_v6 = vld [vmem:[%s743_s5 + $0x8] sm:$0xff]  ;;  %v502_v7 = vld [vmem:[%s743_s5] sm:$0xff]  ;;  %v561_v21 = vmov 32.0  }
   0x6   :  { %82 = vmatpush.bf16.msra.mxu0 %v500_v1  ;;  %120 = vmatpush.bf16.msra.mxu1 %v503_v6  ;;  %v516_v8 = vld [vmem:[%s741_s3] ss:$0 sm:$0xff]  ;;  %528 = vrcp.f32 %v561_v21  ;;  %v505_v33 = vld [vmem:[%s746_s8 + $0x8] sm:$0xff]  ;;  %v507_v34 = vld [vmem:[%s746_s8 + $0x18] sm:$0xff]  ;;  %s412_s1 = sshll.u32 %s749_s11, 4  ;;  %vm355_vm8 = vcmask 257024   ;;  %s413_s1 = int_to_ptr.hbm [resolvable:$true] %s412_s1 }
   0x7   :  { %v517_v11 = vld [vmem:[%s742_s4] ss:$0 sm:$0xff]  ;;  %v509_v35 = vld [vmem:[%s746_s8 + $0x28] sm:$0xff]  ;;  %v511_v36 = vld [vmem:[%s746_s8 + $0x38] sm:$0xff]  ;;  %193 = vmatpush.bf16.msra.mxu2 %v505_v33  ;;  %223 = vmatpush.bf16.msra.mxu3 %v507_v34 }
   0x8   :  { %v504_v37 = vld [vmem:[%s746_s8] sm:$0xff]  ;;  %v506_v38 = vld [vmem:[%s746_s8 + $0x10] sm:$0xff] }
   0x9   :  { %433 = vmatmul.msk.bf16.vlgmr.msra.gmra.mxu0 %vm71_vm0, %v43_v5  ;;  %v508_v39 = vld [vmem:[%s746_s8 + $0x20] sm:$0xff]  ;;  %v510_v40 = vld [vmem:[%s746_s8 + $0x30] sm:$0xff] }
   0xa   :  { %121 = vmatpush.bf16.msra.mxu1 %v502_v7  ;;  %253 = vmatpush.bf16.msrb.mxu0 %v509_v35  ;;  %v518_v50 = vld [vmem:[%s744_s6] ss:$0 sm:$0xff]  ;;  %s562_s6 = smov [#allocation2]  }
   0xb   :  { %194 = vmatpush.bf16.msra.mxu2 %v504_v37  ;;  %224 = vmatpush.bf16.msra.mxu3 %v506_v38  ;;  %v519_v53 = vld [vmem:[%s745_s7] ss:$0 sm:$0xff]  ;;  %s410_s7 = sshll.u32 %s562_s6, 4  ;;  %s411_s7 = int_to_ptr.vmem [resolvable:$true] %s410_s7 }
   0xc   :  { %v529_v22 = vpop.eup %528 }
   0xd   :  { %v131_v23 = vmul.f32 32.0, %v529_v22  ;;  %vm135_vm1 = vweird.f32 %v529_v22 }
   0xe   :  { %283 = vmatpush.bf16.msrb.mxu1 %v511_v36  ;;  %254 = vmatpush.bf16.msrb.mxu0 %v508_v39  ;;  %v520_v39 = vld [vmem:[%s747_s9] ss:$0 sm:$0xff] }
   0xf   :  { %v132_v24 = vsub.f32 1.0, %v131_v23 }
  0x11   :  { %v133_v25 = vmul.f32 %v529_v22, %v132_v24 }
  0x12   :  { %284 = vmatpush.bf16.msrb.mxu1 %v510_v40  ;;  %v522_v40 = vld [vmem:[%s747_s9 + $0x1] ss:$0 sm:$0xff] }
  0x13   :  { %v134_v26 = vadd.f32 %v529_v22, %v133_v25 }
  0x15   :  { %v136_v27 = vsel %vm135_vm1, %v529_v22, %v134_v26 }
  0x76   :  { %v53_v9 = vpop.permute.xlu0 %52 }
  0x77   :  { %v58_v10 = vmul.f32 %v516_v8, %v53_v9 }
  0x86   :  { %v84_v12 = vpop.f32.mrf.mxu0 }
  0x87   :  { %v85_v13 = vadd.f32 %v84_v12, %v58_v10 }
  0x89   :  { %v92_v14 = vadd.f32 %v517_v11, %v85_v13 }
  0x8b   :  { %v93_v15 = vmax.f32 %v92_v14, 0.0 }
  0x8d   :  { %v94_v16 = vpack.c.bf16 %v93_v15, %v93_v15 }
  0x8e   :  { %v86_v17 = vpop.f32.mrf.mxu0 }
  0x8f   :  { %442 = vmatmul.msk.bf16.vlgmr.msra.gmra.mxu1 %vm71_vm0, %v94_v16 }
 0x10c   :  { %v123_v18 = vpop.f32.mrf.mxu1 }
 0x10d   :  { %v127_v19 = vsel %vm71_vm0, %v123_v18, 0.0 }
 0x10e   :  { %128 = vadd.xlane.f32.xlu0 %v127_v19 }
 0x114   :  { %v125_v20 = vpop.f32.mrf.mxu1 }
 0x181   :  { %v129_v28 = vpop.xlane.xlu0 %128 }
 0x182   :  { %v137_v29 = vmul.f32 %v136_v27, %v129_v28 }
 0x184   :  { %v138_v30 = vsub.f32 %v123_v18, %v137_v29 }
 0x186   :  { %v139_v31 = vmul.f32 %v138_v30, %v138_v30 }
 0x188   :  { %v140_v32 = vsel %vm71_vm0, %v139_v31, 0.0 }
 0x189   :  { %141 = vadd.xlane.f32.xlu1 %v140_v32 }
 0x1fc   :  { %v142_v41 = vpop.xlane.xlu1 %141 }
 0x1fd   :  { %v143_v42 = vmul.f32 %v142_v41, %v136_v27 }
 0x1ff   :  { %v144_v43 = vadd.f32 1e-05, %v143_v42  ;;  %v524_v42 = vld [vmem:[%s747_s9 + $0x2] ss:$0 sm:$0xff] }
 0x201   :  { %530 = vrsqrt.f32 %v144_v43  ;;  %vm151_vm3 = vweird.f32 %v144_v43 }
 0x207   :  { %v531_v44 = vpop.eup %530 }
 0x208   :  { %v146_v45 = vmul.f32 %v531_v44, %v144_v43  ;;  %vm152_vm2 = vweird.f32 %v531_v44  ;;  %v526_v43 = vld [vmem:[%s747_s9 + $0x3] ss:$0 sm:$0xff] }
 0x209   :  { %vm153_vm4 = vmor %vm151_vm3, %vm152_vm2 }
 0x20a   :  { %v147_v46 = vmul.f32 %v531_v44, %v146_v45 }
 0x20c   :  { %v148_v47 = vmul.f32 0.5, %v147_v46  ;;  %v523_v46 = vld [vmem:[%s748_s10 + $0x1] ss:$0 sm:$0xff] }
 0x20e   :  { %v149_v48 = vsub.f32 1.5, %v148_v47  ;;  %v525_v47 = vld [vmem:[%s748_s10 + $0x2] ss:$0 sm:$0xff] }
 0x210   :  { %v150_v49 = vmul.f32 %v531_v44, %v149_v48  ;;  %v527_v48 = vld [vmem:[%s748_s10 + $0x3] ss:$0 sm:$0xff] }
 0x212   :  { %v154_v51 = vsel %vm153_vm4, %v531_v44, %v150_v49  ;;  %v521_v44 = vld [vmem:[%s748_s10] ss:$0 sm:$0xff] }
 0x213   :  { %v155_v52 = vmul.f32 %v154_v51, %v138_v30 }
 0x215   :  { %v160_v54 = vmul.f32 %v518_v50, %v155_v52 }
 0x217   :  { %v165_v55 = vadd.f32 %v519_v53, %v160_v54 }
 0x219   :  { %v167_v56 = vpack.c.bf16 %v165_v55, %v165_v55  ;;  %166 = vst.msk [vmem:[#allocation2] sm:$0xff] %vm71_vm0, %v165_v55 }
 0x21a   :  { %415 = dma.vmem_to_hbm [thread:$0]  %s411_s7, 128, %s413_s1, [#allocation3]  }
 0x21b   :  { %451 = vmatmul.msk.bf16.vlgmr.msra.gmra.mxu2 %vm71_vm0, %v167_v56  ;;  %464 = vmatmul.msk.bf16.vlgmr.msra.gmra.mxu3 %vm71_vm0, %v167_v56 }
 0x21c   :  { %477 = vmatmul.msk.bf16.vlgmr.msrb.gmra.mxu0 %vm71_vm0, %v167_v56  ;;  %490 = vmatmul.msk.bf16.vlgmr.msrb.gmra.mxu1 %vm71_vm0, %v167_v56 }
 0x299   :  { %v256_v57 = vpop.f32.mrf.mxu0  ;;  %v286_v58 = vpop.f32.mrf.mxu1 }
 0x29a   :  { %v298_v3 = vsel %vm71_vm0, %v256_v57, 0.0  ;;  %v302_v4 = vsel %vm71_vm0, %v286_v58, 0.0 }
 0x29e   :  { %v196_v59 = vpop.f32.mrf.mxu2  ;;  %v226_v60 = vpop.f32.mrf.mxu3 }
 0x29f   :  { %v294_v61 = vsel %vm71_vm0, %v226_v60, 0.0  ;;  %v290_v62 = vsel %vm71_vm0, %v196_v59, 0.0 }
 0x2a0   :  { %295 = vadd.xlane.f32.xlu2 %v294_v61  ;;  %291 = vadd.xlane.f32.xlu1 %v290_v62 }
 0x2a1   :  { %v258_v63 = vpop.f32.mrf.mxu0  ;;  %v288_v0 = vpop.f32.mrf.mxu1 }
 0x2a6   :  { %v198_v1 = vpop.f32.mrf.mxu2  ;;  %v228_v2 = vpop.f32.mrf.mxu3 }
 0x2a8   :  { %299 = vadd.xlane.f32.xlu2 %v298_v3  ;;  %303 = vadd.xlane.f32.xlu1 %v302_v4 }
 0x313   :  { %v296_v5 = vpop.xlane.xlu2 %295  ;;  %v292_v6 = vpop.xlane.xlu1 %291 }
 0x314   :  { %v297_v7 = vadd.f32 %v296_v5, %v292_v6 }
 0x31b   :  { %v300_v8 = vpop.xlane.xlu2 %299  ;;  %v304_v10 = vpop.xlane.xlu1 %303 }
 0x31c   :  { %v301_v9 = vadd.f32 %v300_v8, %v297_v7 }
 0x31e   :  { %v305_v11 = vadd.f32 %v304_v10, %v301_v9 }
 0x320   :  { %v306_v12 = vmul.f32 0.0078125, %v305_v11 }
 0x322   :  { %v313_v13 = vsub.f32 %v226_v60, %v306_v12  ;;  %v307_v14 = vsub.f32 %v196_v59, %v306_v12  ;;  %v325_v19 = vsub.f32 %v286_v58, %v306_v12  ;;  %v319_v20 = vsub.f32 %v256_v57, %v306_v12 }
 0x324   :  { %v314_v15 = vmul.f32 %v313_v13, %v313_v13  ;;  %v308_v16 = vmul.f32 %v307_v14, %v307_v14  ;;  %v326_v21 = vmul.f32 %v325_v19, %v325_v19  ;;  %v320_v22 = vmul.f32 %v319_v20, %v319_v20 }
 0x326   :  { %v315_v17 = vsel %vm71_vm0, %v314_v15, 0.0  ;;  %v309_v18 = vsel %vm71_vm0, %v308_v16, 0.0  ;;  %v327_v23 = vsel %vm71_vm0, %v326_v21, 0.0  ;;  %v321_v24 = vsel %vm71_vm0, %v320_v22, 0.0 }
 0x327   :  { %316 = vadd.xlane.f32.xlu1 %v315_v17  ;;  %310 = vadd.xlane.f32.xlu2 %v309_v18 }
 0x32f   :  { %328 = vadd.xlane.f32.xlu1 %v327_v23  ;;  %322 = vadd.xlane.f32.xlu2 %v321_v24 }
 0x39a   :  { %v317_v25 = vpop.xlane.xlu1 %316  ;;  %v311_v26 = vpop.xlane.xlu2 %310 }
 0x39b   :  { %v318_v27 = vadd.f32 %v317_v25, %v311_v26 }
 0x3a2   :  { %v323_v28 = vpop.xlane.xlu2 %322  ;;  %v329_v30 = vpop.xlane.xlu1 %328 }
 0x3a3   :  { %v324_v29 = vadd.f32 %v323_v28, %v318_v27 }
 0x3a5   :  { %v330_v31 = vadd.f32 %v329_v30, %v324_v29 }
 0x3a7   :  { %v331_v32 = vmul.f32 0.0078125, %v330_v31 }
 0x3a9   :  { %v332_v33 = vadd.f32 1e-05, %v331_v32 }
 0x3ab   :  { %532 = vrsqrt.f32 %v332_v33  ;;  %vm339_vm6 = vweird.f32 %v332_v33 }
 0x3b1   :  { %v533_v34 = vpop.eup %532 }
 0x3b2   :  { %v334_v35 = vmul.f32 %v533_v34, %v332_v33  ;;  %vm340_vm5 = vweird.f32 %v533_v34 }
 0x3b3   :  { %vm341_vm7 = vmor %vm339_vm6, %vm340_vm5 }
 0x3b4   :  { %v335_v36 = vmul.f32 %v533_v34, %v334_v35 }
 0x3b6   :  { %v336_v37 = vmul.f32 0.5, %v335_v36 }
 0x3b8   :  { %v337_v38 = vsub.f32 1.5, %v336_v37 }
 0x3ba   :  { %v338_v41 = vmul.f32 %v533_v34, %v337_v38 }
 0x3bc   :  { %v342_v45 = vsel %vm341_vm7, %v533_v34, %v338_v41 }
 0x3bd   :  { %v343_v49 = vmul.f32 %v342_v45, %v307_v14  ;;  %v357_v50 = vmul.f32 %v342_v45, %v313_v13  ;;  %v373_v51 = vmul.f32 %v342_v45, %v319_v20  ;;  %v389_v52 = vmul.f32 %v342_v45, %v325_v19 }
 0x3bf   :  { %v348_v53 = vmul.f32 %v520_v39, %v343_v49  ;;  %v363_v54 = vmul.f32 %v522_v40, %v357_v50  ;;  %v379_v55 = vmul.f32 %v524_v42, %v373_v51  ;;  %v395_v56 = vmul.f32 %v526_v43, %v389_v52 }
 0x3c1   :  { %v353_v57 = vadd.f32 %v521_v44, %v348_v53  ;;  %v369_v58 = vadd.f32 %v523_v46, %v363_v54  ;;  %v385_v59 = vadd.f32 %v525_v47, %v379_v55  ;;  %v401_v60 = vadd.f32 %v527_v48, %v395_v56 }
 0x3c3   :  { %v354_v61 = vpack.c.bf16 %v353_v57, %v353_v57  ;;  %v370_v62 = vpack.c.bf16 %v369_v58, %v369_v58  ;;  %v386_v63 = vpack.c.bf16 %v385_v59, %v385_v59  ;;  %v402_v0 = vpack.c.bf16 %v401_v60, %v401_v60 }
 0x3c5   :  { %356 = vst.msk [vmem:[%s750_s12] sm:$0xf] %vm355_vm8, %v354_v61 }
 0x3c6   :  { %493 = vst.msk [vmem:[%s750_s12 + $0x4] sm:$0xf] %vm355_vm8, %v370_v62 }
 0x3c7   :  { %496 = vst.msk [vmem:[%s750_s12 + $0x8] sm:$0xf] %vm355_vm8, %v386_v63 }
 0x3c8   :  { %499 = vst.msk [vmem:[%s750_s12 + $0xc] sm:$0xf] %vm355_vm8, %v402_v0 }
 0x3c9   :  { %558 = dma.done.wait [#allocation3], 128  }
 0x3ca   :  { %559 = vsyncadd [#allocation3], 4294967168 }
 0x3cb   :  { %424 = vsyncpa [#allocation3], 1 }

</bundles_post_ra>
